<compile_context>
chip_gen: v7x
topology: tpu7x:2x2x1
jax: 0.10.0
libtpu: 0.0.40
codegen_flags: <defaults>
</compile_context>

<pallas_src>
import jax
import jax.numpy as jnp
from jax import lax
from jax.experimental import pallas as pl
from jax.experimental.pallas import tpu as pltpu

STATS_ROWS = 8          # sublane-aligned rows used to store each tile's (1, O) stats
DEFAULT_TILE_N = 2048   # >=512-row tiles reach ~85% of HBM roofline (measured)


def _round_up(n, m):
    return (n + m - 1) // m * m


def _make_pass1_kernel(n_valid, tile_n, ragged):
    """Pass 1: logits for one batch tile + per-tile dim=0 softmax stats."""

    def kernel(x_ref, w1_ref, b1_ref, w2_ref, b2_ref, logits_ref, m_ref, l_ref):
        i = pl.program_id(0)

        # Linear 1 (MXU, f32 accumulate) + ReLU.  x/w1 may be bf16 -> native MXU rate.
        h = jnp.dot(x_ref[...], w1_ref[...],
                    preferred_element_type=jnp.float32) + b1_ref[...]
        h = jnp.maximum(h, 0.0)

        # Linear 2: only O(=4) output columns -> negligible MXU cost; keep f32.
        logits = jnp.dot(h, w2_ref[...],
                         preferred_element_type=jnp.float32) + b2_ref[...]

        # Store logits for the normalize pass.  Rows past n_valid (tail tile only)
        # fall in the clipped writeback region and are discarded.
        logits_ref[...] = logits

        if ragged:
            # Only the tail tile contains out-of-range rows; mask them to -inf so
            # they do not perturb the dim=0 (batch) statistics.  This MUST happen
            # before the max below (every tile has >=1 valid row, so the column
            # max stays finite and exp(-inf - max) == 0).  Cost: one iota+select
            # over (tile_n, O) -- negligible next to the exp.
            rows = lax.broadcasted_iota(jnp.int32, logits.shape, 0) + i * tile_n
            logits = jnp.where(rows < n_valid, logits, -jnp.inf)

        t_max = jnp.max(logits, axis=0, keepdims=True)                    # (1, O)
        t_sum = jnp.sum(jnp.exp(logits - t_max), axis=0, keepdims=True)   # (1, O)

        # Broadcast the (1, O) stats over 8 sublanes so the stats outputs keep
        # (8, 128)-friendly block shapes; the wrapper reads row 0 of each tile.
        m_ref[...] = jnp.broadcast_to(t_max, m_ref.shape)
        l_ref[...] = jnp.broadcast_to(t_sum, l_ref.shape)

    return kernel


def _normalize_kernel(logits_ref, m_ref, l_ref, o_ref):
    """Pass 2: out = exp(logits - m) * (1 / l) with the EXACT reciprocal."""
    e = jnp.exp(logits_ref[...] - m_ref[...])
    o_ref[...] = (e * pl.reciprocal(l_ref[...], approx=False)).astype(o_ref.dtype)


def net_forward(x, w1, b1, w2, b2, *, tile_n=DEFAULT_TILE_N):
    """x: (N, F) f32 or bf16; w1: (F, H); b1: (H,)/(1,H); w2: (H, O); b2: (O,)/(1,O).

    Returns softmax(relu(x @ w1 + b1) @ w2 + b2, axis=0), shape (N, O), f32.
    """
    N, F = x.shape
    H = w1.shape[1]
    O = w2.shape[1]

    # bf16 activations => bf16 first matmul (half the x DMA, native MXU rate).
    w1 = w1.astype(x.dtype)
    b1 = jnp.reshape(b1, (1, H)).astype(jnp.float32)
    w2 = w2.astype(jnp.float32)
    b2 = jnp.reshape(b2, (1, O)).astype(jnp.float32)

    # Batch tile: multiple of 16 (covers f32 (8,·) and bf16 (16,·) sublane packing).
    tile = min(int(tile_n), _round_up(N, 16))
    tile = _round_up(tile, 16)
    nt = (N + tile - 1) // tile
    ragged = (N % tile) != 0

    full = lambda a: pl.BlockSpec(a.shape, lambda i: (0,) * a.ndim)

    cparams = pltpu.CompilerParams(
        dimension_semantics=("parallel",),        # independent batch tiles (v7x: 2 TCs)
        vmem_limit_bytes=32 * 1024 * 1024,        # explicit; tiles use far less
    )

    # ---- Pass 1: logits + per-tile column max / sum-exp -------------------
    flops1 = 2 * N * (F * H + H * O)
    bytes1 = (x.size * x.dtype.itemsize + w1.size * w1.dtype.itemsize
              + (b1.size + w2.size + b2.size) * 4
              + N * O * 4 + 2 * nt * STATS_ROWS * O * 4)
    cost1 = pl.CostEstimate(flops=int(flops1), transcendentals=int(N * O),
                            bytes_accessed=int(bytes1))

    logits, m_tiles, l_tiles = pl.pallas_call(
        _make_pass1_kernel(N, tile, ragged),
        grid=(nt,),
        out_shape=(
            jax.ShapeDtypeStruct((N, O), jnp.float32),                  # logits
            jax.ShapeDtypeStruct((nt * STATS_ROWS, O), jnp.float32),    # per-tile max
            jax.ShapeDtypeStruct((nt * STATS_ROWS, O), jnp.float32),    # per-tile sum-exp
        ),
        in_specs=[
            pl.BlockSpec((tile, F), lambda i: (i, 0)),
            full(w1), full(b1), full(w2), full(b2),
        ],
        out_specs=(
            pl.BlockSpec((tile, O), lambda i: (i, 0)),
            pl.BlockSpec((STATS_ROWS, O), lambda i: (i, 0)),
            pl.BlockSpec((STATS_ROWS, O), lambda i: (i, 0)),
        ),
        compiler_params=cparams,
        cost_estimate=cost1,
    )(x, w1, b1, w2, b2)

    # ---- Tiny cross-tile combine (nt x O elements) in plain JAX -----------
    m_part = m_tiles[::STATS_ROWS]                                    # (nt, O)
    l_part = l_tiles[::STATS_ROWS]                                    # (nt, O)
    m = jnp.max(m_part, axis=0, keepdims=True)                        # (1, O)
    l = jnp.sum(l_part * jnp.exp(m_part - m), axis=0, keepdims=True)  # (1, O)

    # ---- Pass 2: normalize each tile with the global stats ----------------
    cost2 = pl.CostEstimate(flops=int(3 * N * O), transcendentals=int(N * O),
                            bytes_accessed=int(2 * N * O * 4 + 2 * O * 4))

    out = pl.pallas_call(
        _normalize_kernel,
        grid=(nt,),
        out_shape=jax.ShapeDtypeStruct((N, O), jnp.float32),
        in_specs=[
            pl.BlockSpec((tile, O), lambda i: (i, 0)),
            pl.BlockSpec((1, O), lambda i: (0, 0)),
            pl.BlockSpec((1, O), lambda i: (0, 0)),
        ],
        out_specs=pl.BlockSpec((tile, O), lambda i: (i, 0)),
        compiler_params=cparams,
        cost_estimate=cost2,
    )(logits, m, l)

    return out


def reference_forward(x, w1, b1, w2, b2):
    x = x.astype(jnp.float32)
    h = jnp.maximum(x @ w1 + jnp.reshape(b1, (1, -1)), 0.0)
    logits = h @ w2 + jnp.reshape(b2, (1, -1))
    return jax.nn.softmax(logits, axis=0)


if __name__ == "__main__":
    # Shapes consistent with the module: Net(n_feature=16, n_hidden=32, n_output=4)
    F, H, O = 16, 32, 4

    key = jax.random.PRNGKey(0)
    kx1, k1, kb1, k2, kb2, kx2, kx3 = jax.random.split(key, 7)

    # Deterministic param init (uniform, like torch Linear default scale 1/sqrt(fan_in))
    w1 = jax.random.uniform(k1, (F, H), jnp.float32, -1.0, 1.0) / jnp.sqrt(F)
    b1 = jax.random.uniform(kb1, (1, H), jnp.float32, -1.0, 1.0) / jnp.sqrt(F)
    w2 = jax.random.uniform(k2, (H, O), jnp.float32, -1.0, 1.0) / jnp.sqrt(H)
    b2 = jax.random.uniform(kb2, (1, O), jnp.float32, -1.0, 1.0) / jnp.sqrt(H)

    fwd = jax.jit(net_forward, static_argnames=("tile_n",))

    # Case 1: small batch, f32 (single ragged tile -> tail mask path).
    N1 = 8
    x1 = jax.random.normal(kx1, (N1, F), dtype=jnp.float32)
    out1 = jax.block_until_ready(fwd(x1, w1, b1, w2, b2))
    ref1 = reference_forward(x1, w1, b1, w2, b2)
    assert out1.shape == (N1, O)
    assert jnp.allclose(out1, ref1, atol=2e-3, rtol=2e-3), "mismatch vs reference (N=8)"
    assert jnp.allclose(jnp.sum(out1, axis=0), jnp.ones((O,)), atol=1e-4)

    # Case 2: multi-tile ragged batch (exercises the cross-tile softmax combine).
    N2 = 300
    x2 = jax.random.normal(kx2, (N2, F), dtype=jnp.float32)
    out2 = jax.block_until_ready(fwd(x2, w1, b1, w2, b2, tile_n=128))
    ref2 = reference_forward(x2, w1, b1, w2, b2)
    assert out2.shape == (N2, O)
    assert jnp.allclose(out2, ref2, atol=2e-3, rtol=2e-3), "mismatch vs reference (N=300)"
    assert jnp.allclose(jnp.sum(out2, axis=0), jnp.ones((O,)), atol=1e-4)

    # Case 3: bf16 activations (half the x DMA stream, bf16 MXU; f32 accumulation).
    N3 = 13
    x3 = jax.random.normal(kx3, (N3, F), dtype=jnp.float32).astype(jnp.bfloat16)
    out3 = jax.block_until_ready(fwd(x3, w1, b1, w2, b2))
    ref3 = reference_forward(x3, w1, b1, w2, b2)
    assert out3.shape == (N3, O)
    assert jnp.allclose(out3, ref3, atol=2e-2, rtol=2e-2), "mismatch vs reference (bf16)"
    assert jnp.allclose(jnp.sum(out3, axis=0), jnp.ones((O,)), atol=1e-3)

    print("KERNEL_OK")
</pallas_src>

<mosaic_0001>
module attributes {stable_mosaic.version = 11 : i64} {
  func.func @_normalize_kernel(%arg0: i32, %arg1: memref<16x4xf32, #tpu.memory_space<vmem>>, %arg2: memref<1x4xf32, #tpu.memory_space<vmem>>, %arg3: memref<1x4xf32, #tpu.memory_space<vmem>>, %arg4: memref<16x4xf32, #tpu.memory_space<vmem>>) attributes {dimension_semantics = [#tpu.dimension_semantics<parallel>], iteration_bounds = array<i64: 1>, scalar_prefetch = 0 : i64, scratch_operands = 0 : i64, tpu.core_type = #tpu.core_type<tc>, window_params = [{transform_indices = @transform_0, window_bounds = array<i64: 16, 4>}, {pipeline_mode = #tpu.pipeline_mode<synchronous>, transform_indices = @transform_1, window_bounds = array<i64: 1, 4>}, {pipeline_mode = #tpu.pipeline_mode<synchronous>, transform_indices = @transform_2, window_bounds = array<i64: 1, 4>}, {transform_indices = @transform_3, window_bounds = array<i64: 16, 4>}]} {
    %c0 = arith.constant 0 : index
    %c0_0 = arith.constant 0 : index
    %0 = vector.load %arg1[%c0, %c0_0] : memref<16x4xf32, #tpu.memory_space<vmem>>, vector<16x4xf32>
    %c0_1 = arith.constant 0 : index
    %c0_2 = arith.constant 0 : index
    %1 = vector.load %arg2[%c0_1, %c0_2] : memref<1x4xf32, #tpu.memory_space<vmem>>, vector<1x4xf32>
    %2 = vector.broadcast %1 : vector<1x4xf32> to vector<16x4xf32>
    %3 = arith.subf %0, %2 : vector<16x4xf32>
    %4 = math.exp %3 : vector<16x4xf32>
    %c0_3 = arith.constant 0 : index
    %c0_4 = arith.constant 0 : index
    %5 = vector.load %arg3[%c0_3, %c0_4] : memref<1x4xf32, #tpu.memory_space<vmem>>, vector<1x4xf32>
    %6 = tpu.reciprocal %5 : vector<1x4xf32> -> vector<1x4xf32>
    %7 = vector.broadcast %6 : vector<1x4xf32> to vector<16x4xf32>
    %8 = arith.mulf %4, %7 : vector<16x4xf32>
    %c0_5 = arith.constant 0 : index
    %c0_6 = arith.constant 0 : index
    %9 = vector.load %arg4[%c0_5, %c0_6] : memref<16x4xf32, #tpu.memory_space<vmem>>, vector<16x4xf32>
    tpu.vector_store %arg4[%c0_5, %c0_6], %8 {strides = array<i32>} : memref<16x4xf32, #tpu.memory_space<vmem>>, vector<16x4xf32>,
    return
  }
  func.func @transform_0(%arg0: i32) -> (i32, i32) {
    %c0_i32 = arith.constant 0 : i32
    %c0_i32_0 = arith.constant 0 : i32
    return %arg0, %c0_i32 : i32, i32
  }
  func.func @transform_1(%arg0: i32) -> (i32, i32) {
    %c0_i32 = arith.constant 0 : i32
    %c0_i32_0 = arith.constant 0 : i32
    %c0_i32_1 = arith.constant 0 : i32
    return %c0_i32, %c0_i32_0 : i32, i32
  }
  func.func @transform_2(%arg0: i32) -> (i32, i32) {
    %c0_i32 = arith.constant 0 : i32
    %c0_i32_0 = arith.constant 0 : i32
    %c0_i32_1 = arith.constant 0 : i32
    return %c0_i32, %c0_i32_0 : i32, i32
  }
  func.func @transform_3(%arg0: i32) -> (i32, i32) {
    %c0_i32 = arith.constant 0 : i32
    %c0_i32_0 = arith.constant 0 : i32
    return %arg0, %c0_i32 : i32, i32
  }
}

module attributes {stable_mosaic.version = 11 : i64} {
  func.func @kernel(%arg0: i32, %arg1: memref<16x16xf32, #tpu.memory_space<vmem>>, %arg2: memref<16x32xf32, #tpu.memory_space<vmem>>, %arg3: memref<1x32xf32, #tpu.memory_space<vmem>>, %arg4: memref<32x4xf32, #tpu.memory_space<vmem>>, %arg5: memref<1x4xf32, #tpu.memory_space<vmem>>, %arg6: memref<16x4xf32, #tpu.memory_space<vmem>>, %arg7: memref<8x4xf32, #tpu.memory_space<vmem>>, %arg8: memref<8x4xf32, #tpu.memory_space<vmem>>) attributes {dimension_semantics = [#tpu.dimension_semantics<parallel>], iteration_bounds = array<i64: 1>, scalar_prefetch = 0 : i64, scratch_operands = 0 : i64, tpu.core_type = #tpu.core_type<tc>, window_params = [{transform_indices = @transform_0, window_bounds = array<i64: 16, 16>}, {pipeline_mode = #tpu.pipeline_mode<synchronous>, transform_indices = @transform_1, window_bounds = array<i64: 16, 32>}, {pipeline_mode = #tpu.pipeline_mode<synchronous>, transform_indices = @transform_2, window_bounds = array<i64: 1, 32>}, {pipeline_mode = #tpu.pipeline_mode<synchronous>, transform_indices = @transform_3, window_bounds = array<i64: 32, 4>}, {pipeline_mode = #tpu.pipeline_mode<synchronous>, transform_indices = @transform_4, window_bounds = array<i64: 1, 4>}, {transform_indices = @transform_5, window_bounds = array<i64: 16, 4>}, {transform_indices = @transform_6, window_bounds = array<i64: 8, 4>}, {transform_indices = @transform_7, window_bounds = array<i64: 8, 4>}]} {
    %c0 = arith.constant 0 : index
    %c0_0 = arith.constant 0 : index
    %0 = vector.load %arg1[%c0, %c0_0] : memref<16x16xf32, #tpu.memory_space<vmem>>, vector<16x16xf32>
    %c0_1 = arith.constant 0 : index
    %c0_2 = arith.constant 0 : index
    %1 = vector.load %arg2[%c0_1, %c0_2] : memref<16x32xf32, #tpu.memory_space<vmem>>, vector<16x32xf32>
    %cst = arith.constant dense<0.000000e+00> : vector<16x32xf32>
    %2 = tpu.matmul %0, %1, %cst {dimension_numbers = #tpu.dot_dimension_numbers<[1], [0], [0], [1], [0, 0, 1, 1], [], []>} : vector<16x16xf32>, vector<16x32xf32>, vector<16x32xf32> -> vector<16x32xf32>
    %c0_3 = arith.constant 0 : index
    %c0_4 = arith.constant 0 : index
    %3 = vector.load %arg3[%c0_3, %c0_4] : memref<1x32xf32, #tpu.memory_space<vmem>>, vector<1x32xf32>
    %4 = vector.broadcast %3 : vector<1x32xf32> to vector<16x32xf32>
    %5 = arith.addf %2, %4 : vector<16x32xf32>
    %cst_5 = arith.constant 0.000000e+00 : f32
    %6 = vector.broadcast %cst_5 : f32 to vector<16x32xf32>
    %7 = arith.maximumf %5, %6 : vector<16x32xf32>
    %c0_6 = arith.constant 0 : index
    %c0_7 = arith.constant 0 : index
    %8 = vector.load %arg4[%c0_6, %c0_7] : memref<32x4xf32, #tpu.memory_space<vmem>>, vector<32x4xf32>
    %cst_8 = arith.constant dense<0.000000e+00> : vector<16x4xf32>
    %9 = tpu.matmul %7, %8, %cst_8 {dimension_numbers = #tpu.dot_dimension_numbers<[1], [0], [0], [1], [0, 0, 1, 1], [], []>} : vector<16x32xf32>, vector<32x4xf32>, vector<16x4xf32> -> vector<16x4xf32>
    %c0_9 = arith.constant 0 : index
    %c0_10 = arith.constant 0 : index
    %10 = vector.load %arg5[%c0_9, %c0_10] : memref<1x4xf32, #tpu.memory_space<vmem>>, vector<1x4xf32>
    %11 = vector.broadcast %10 : vector<1x4xf32> to vector<16x4xf32>
    %12 = arith.addf %9, %11 : vector<16x4xf32>
    %c0_11 = arith.constant 0 : index
    %c0_12 = arith.constant 0 : index
    %13 = vector.load %arg6[%c0_11, %c0_12] : memref<16x4xf32, #tpu.memory_space<vmem>>, vector<16x4xf32>
    tpu.vector_store %arg6[%c0_11, %c0_12], %12 {strides = array<i32>} : memref<16x4xf32, #tpu.memory_space<vmem>>, vector<16x4xf32>,
    %14 = tpu.iota {dimensions = array<i32: 0>} : vector<16x4xi32>
    %c16_i32 = arith.constant 16 : i32
    %15 = arith.muli %arg0, %c16_i32 : i32
    %16 = vector.broadcast %15 : i32 to vector<16x4xi32>
    %17 = arith.addi %14, %16 : vector<16x4xi32>
    %c8_i32 = arith.constant 8 : i32
    %18 = vector.broadcast %c8_i32 : i32 to vector<16x4xi32>
    %19 = arith.cmpi slt, %17, %18 : vector<16x4xi32>
    %cst_13 = arith.constant 0xFF800000 : f32
    %20 = vector.broadcast %cst_13 : f32 to vector<16x4xf32>
    %21 = arith.select %19, %12, %20 : vector<16x4xi1>, vector<16x4xf32>
    %cst_14 = arith.constant dense<0xFF800000> : vector<4xf32>
    %22 = vector.multi_reduction <maximumf>, %21, %cst_14 [0] : vector<16x4xf32> to vector<4xf32>
    %23 = vector.shape_cast %22 : vector<4xf32> to vector<1x4xf32>
    %24 = vector.broadcast %23 : vector<1x4xf32> to vector<16x4xf32>
    %25 = arith.subf %21, %24 : vector<16x4xf32>
    %26 = math.exp %25 : vector<16x4xf32>
    %cst_15 = arith.constant dense<0.000000e+00> : vector<4xf32>
    %27 = vector.multi_reduction <add>, %26, %cst_15 [0] : vector<16x4xf32> to vector<4xf32>
    %28 = vector.shape_cast %27 : vector<4xf32> to vector<1x4xf32>
    %29 = vector.shape_cast %23 : vector<1x4xf32> to vector<1x4xf32>
    %30 = vector.broadcast %29 : vector<1x4xf32> to vector<8x4xf32>
    %c0_16 = arith.constant 0 : index
    %c0_17 = arith.constant 0 : index
    %31 = vector.load %arg7[%c0_16, %c0_17] : memref<8x4xf32, #tpu.memory_space<vmem>>, vector<8x4xf32>
    tpu.vector_store %arg7[%c0_16, %c0_17], %30 {strides = array<i32>} : memref<8x4xf32, #tpu.memory_space<vmem>>, vector<8x4xf32>,
    %32 = vector.shape_cast %28 : vector<1x4xf32> to vector<1x4xf32>
    %33 = vector.broadcast %32 : vector<1x4xf32> to vector<8x4xf32>
    %c0_18 = arith.constant 0 : index
    %c0_19 = arith.constant 0 : index
    %34 = vector.load %arg8[%c0_18, %c0_19] : memref<8x4xf32, #tpu.memory_space<vmem>>, vector<8x4xf32>
    tpu.vector_store %arg8[%c0_18, %c0_19], %33 {strides = array<i32>} : memref<8x4xf32, #tpu.memory_space<vmem>>, vector<8x4xf32>,
    return
  }
  func.func @transform_0(%arg0: i32) -> (i32, i32) {
    %c0_i32 = arith.constant 0 : i32
    %c0_i32_0 = arith.constant 0 : i32
    return %arg0, %c0_i32 : i32, i32
  }
  func.func @transform_1(%arg0: i32) -> (i32, i32) {
    %c0_i32 = arith.constant 0 : i32
    %c0_i32_0 = arith.constant 0 : i32
    %c0_i32_1 = arith.constant 0 : i32
    return %c0_i32, %c0_i32_0 : i32, i32
  }
  func.func @transform_2(%arg0: i32) -> (i32, i32) {
    %c0_i32 = arith.constant 0 : i32
    %c0_i32_0 = arith.constant 0 : i32
    %c0_i32_1 = arith.constant 0 : i32
    return %c0_i32, %c0_i32_0 : i32, i32
  }
  func.func @transform_3(%arg0: i32) -> (i32, i32) {
    %c0_i32 = arith.constant 0 : i32
    %c0_i32_0 = arith.constant 0 : i32
    %c0_i32_1 = arith.constant 0 : i32
    return %c0_i32, %c0_i32_0 : i32, i32
  }
  func.func @transform_4(%arg0: i32) -> (i32, i32) {
    %c0_i32 = arith.constant 0 : i32
    %c0_i32_0 = arith.constant 0 : i32
    %c0_i32_1 = arith.constant 0 : i32
    return %c0_i32, %c0_i32_0 : i32, i32
  }
  func.func @transform_5(%arg0: i32) -> (i32, i32) {
    %c0_i32 = arith.constant 0 : i32
    %c0_i32_0 = arith.constant 0 : i32
    return %arg0, %c0_i32 : i32, i32
  }
  func.func @transform_6(%arg0: i32) -> (i32, i32) {
    %c0_i32 = arith.constant 0 : i32
    %c0_i32_0 = arith.constant 0 : i32
    return %arg0, %c0_i32 : i32, i32
  }
  func.func @transform_7(%arg0: i32) -> (i32, i32) {
    %c0_i32 = arith.constant 0 : i32
    %c0_i32_0 = arith.constant 0 : i32
    return %arg0, %c0_i32 : i32, i32
  }
}

</mosaic_0001>

<bundles_post_ra>
// kernel: net_forward.3
= control target key start
LH: loop header
LB: loop body
LE: loop exit
PB: predicated region body
PF: predicated region fallthrough
CT: control target
= control target key end

     0   :  { %v32_v3 = vlaneseq  ;;  %vm39_vm0 = vcmask 31744   ;;  %s124_s0 = inlined_call_operand.vmem [shape: f32[8,4], index: 0, kind: input, shape index: {}]   ;;  %s125_s1 = inlined_call_operand.vmem [shape: f32[1,4], index: 1, kind: input, shape index: {}]   ;;  %s126_s2 = inlined_call_operand.vmem [shape: f32[1,4], index: 2, kind: input, shape index: {}]   ;;  %s127_s3 = inlined_call_operand.vmem [shape: f32[8,4], index: 3, kind: output, shape index: {}]  }
   0x1   :  { %v14_v0 = vld [vmem:[%s124_s0] sm:$0xff]  ;;  %v15_v5 = vld [vmem:[%s124_s0 + $0x8] sm:$0xff] }
   0x2   :  { %v82_v1 = vld [vmem:[%s125_s1] ss:$0 sm:$0xff]  ;;  %v33_v8 = vshrl.u32 %v32_v3, 7 }
   0x3   :  { %v29_v2 = vld [vmem:[%s126_s2] sm:$0x1]  ;;  %v23_v4 = vsub.f32 %v14_v0, %v82_v1  ;;  %v24_v6 = vsub.f32 %v15_v5, %v82_v1 }
   0x4   :  { %83 = vrcp.f32 %v29_v2  ;;  %v34_v10 = vsub.s32 0, %v33_v8 }
   0x5   :  { %v25_v7 = vmul.f32 1.442695, %v23_v4  ;;  %v27_v9 = vmul.f32 1.442695, %v24_v6 }
   0x7   :  { %85 = vpow2.f32 %v25_v7 }
   0x8   :  { %87 = vpow2.f32 %v27_v9 }
   0xe   :  { %v84_v11 = vpop.eup %83 }
   0xf   :  { %v35_v12 = vrot.slane %v84_v11, %v34_v10 }
  0x11   :  { %v86_v13 = vpop.eup %85 }
  0x12   :  { %v88_v14 = vpop.eup %87  ;;  %v37_v15 = vmul.f32 %v86_v13, %v35_v12 }
  0x14   :  { %40 = vst.msk [vmem:[#allocation2] sm:$0xff] %vm39_vm0, %v37_v15 }
  0x1b   :  { %v71_v16 = vld [vmem:[#allocation2] sm:$0xff] }
  0x1c   :  { %72 = vst [vmem:[%s127_s3] sm:$0xff] %v71_v16 }

// kernel: net_forward.2
= control target key start
LH: loop header
LB: loop body
LE: loop exit
PB: predicated region body
PF: predicated region fallthrough
CT: control target
= control target key end

     0   :  { %vm34_vm0 = vcmask 130048   ;;  %vm129_vm1 = vcmask 261120   ;;  %vm211_vm2 = vcmask 31744   ;;  %s434_s0 = inlined_call_operand.vmem [shape: f32[8,16], index: 0, kind: input, shape index: {}]   ;;  %s435_s1 = inlined_call_operand.vmem [shape: f32[16,32], index: 1, kind: input, shape index: {}]   ;;  %s436_s2 = inlined_call_operand.vmem [shape: f32[1,32], index: 2, kind: input, shape index: {}]   ;;  %s437_s3 = inlined_call_operand.vmem [shape: f32[32,4], index: 3, kind: input, shape index: {}]   ;;  %s438_s4 = inlined_call_operand.vmem [shape: f32[1,4], index: 4, kind: input, shape index: {}]   ;;  %s439_s5 = inlined_call_operand.vmem [shape: f32[8,4], index: 5, kind: output, shape index: {0}]   ;;  %s440_s6 = inlined_call_operand.vmem [shape: f32[8,4], index: 6, kind: output, shape index: {1}]   ;;  %s441_s7 = inlined_call_operand.vmem [shape: f32[8,4], index: 7, kind: output, shape index: {2}]  }
   0x1   :  { %v25_v0 = vld [vmem:[%s435_s1] sm:$0xff]  ;;  %v26_v1 = vld [vmem:[%s435_s1 + $0x8] sm:$0xff]  ;;  %v120_v8 = vld [vmem:[%s437_s3 + $0x10] sm:$0xff] }
   0x2   :  { %v23_v2 = vld [vmem:[%s434_s0] sm:$0xff]  ;;  %v333_v3 = vpack.c.bf16 %v26_v1, %v25_v0  ;;  %v119_v5 = vld [vmem:[%s437_s3 + $0x8] sm:$0xff]  ;;  %v121_v9 = vld [vmem:[%s437_s3 + $0x18] sm:$0xff] }
   0x3   :  { %319 = vmatprep.mubr.msk.f32.mxu0 %vm34_vm0, %v23_v2  ;;  %v118_v4 = vld [vmem:[%s437_s3] sm:$0xff]  ;;  %v24_v7 = vld [vmem:[%s434_s0 + $0x8] sm:$0xff]  ;;  %v341_v10 = vpack.c.bf16 %v121_v9, %v120_v8 }
   0x4   :  { %v337_v6 = vpack.c.bf16 %v119_v5, %v118_v4  ;;  %334 = vmatprep.subr.bf16.mxu0 %v333_v3  ;;  %v299_v11 = vld [vmem:[%s436_s2] ss:$0 sm:$0xff] }
   0x5   :  { %336 = vmatpush3.bf16.msra.mxu0 %v333_v3  ;;  %v302_v18 = vld [vmem:[%s438_s4] ss:$0 sm:$0xff] }
   0x6   :  { %338 = vmatprep.subr.bf16.mxu1 %v337_v6 }
   0x7   :  { %340 = vmatpush3.bf16.msra.mxu1 %v337_v6 }
   0x8   :  { %320 = vmatmul.mubr.msk.f32.vlgmr.msra.gmra.mrb[0].mxu0 %vm34_vm0, %v24_v7  ;;  %342 = vmatprep.subr.bf16.mxu1 %v341_v10 }
   0xb   :  { %344 = vmatpush3.bf16.msra.mxu1 %v341_v10 }
  0xdb   :  { %v321_v12 = vpop.f32.mrb[0].mxu0 }
  0xdc   :  { %v113_v13 = vadd.f32 %v321_v12, %v299_v11  ;;  %v107_v14 = vpop.f32.mrb[1].mxu0 }
  0xdd   :  { %v108_v15 = vadd.f32 %v299_v11, %v107_v14 }
  0xde   :  { %v117_v17 = vmax.f32 %v113_v13, 0.0 }
  0xdf   :  { %v116_v16 = vmax.f32 %v108_v15, 0.0 }
  0xe1   :  { %330 = vmatprep.mubr.msk.f32.mxu1 %vm129_vm1, %v116_v16 }
  0xe2   :  { %331 = vmatmul.mubr.msk.f32.vlgmr.msra.gmra.mrb[0].mxu1 %vm129_vm1, %v117_v17 }
 0x1b5   :  { %v332_v19 = vpop.f32.mrb[0].mxu1 }
 0x1b6   :  { %v202_v20 = vpop.f32.mrb[1].mxu1 }
 0x1b7   :  { %v203_v21 = vadd.f32 %v302_v18, %v202_v20 }
 0x1b9   :  { %212 = vst.msk [vmem:[#allocation2] sm:$0xff] %vm211_vm2, %v203_v21  ;;  %v225_v22 = vsel %vm211_vm2, %v203_v21, -inf }
 0x1ba   :  { %v228_v23 = vrot.slane %v225_v22, 4 }
 0x1bc   :  { %v229_v24 = vmax.f32 %v225_v22, %v228_v23 }
 0x1be   :  { %v230_v25 = vrot.slane %v229_v24, 2 }
 0x1c0   :  { %v231_v26 = vmax.f32 %v229_v24, %v230_v25  ;;  %v280_v27 = vld [vmem:[#allocation2] sm:$0xff] }
 0x1c1   :  { %281 = vst [vmem:[%s439_s5] sm:$0xff] %v280_v27 }
 0x1c2   :  { %v232_v28 = vrot.slane %v231_v26, 1 }
 0x1c4   :  { %v233_v29 = vmax.f32 %v231_v26, %v232_v28 }
 0x1c6   :  { %v234_v30 = vsub.f32 %v203_v21, %v233_v29  ;;  %v235_v31 = vsub.f32 -inf, %v233_v29  ;;  %249 = vst.msk [vmem:[%s440_s6] sm:$0xff] %vm211_vm2, %v233_v29 }
 0x1c8   :  { %v236_v32 = vmul.f32 1.442695, %v234_v30  ;;  %v238_v33 = vmul.f32 1.442695, %v235_v31 }
 0x1ca   :  { %345 = vpow2.f32 %v236_v32 }
 0x1cb   :  { %347 = vpow2.f32 %v238_v33 }
 0x1d4   :  { %v346_v34 = vpop.eup %345 }
 0x1d5   :  { %v348_v35 = vpop.eup %347  ;;  %v240_v36 = vsel %vm211_vm2, %v346_v34, 0.0 }
 0x1d6   :  { %v241_v37 = vsel %vm211_vm2, %v348_v35, 0.0 }
 0x1d7   :  { %v242_v38 = vadd.f32 %v241_v37, %v240_v36 }
 0x1d9   :  { %v243_v39 = vrot.slane %v242_v38, 4 }
 0x1db   :  { %v244_v40 = vadd.f32 %v243_v39, %v242_v38 }
 0x1dd   :  { %v245_v41 = vrot.slane %v244_v40, 2 }
 0x1df   :  { %v246_v42 = vadd.f32 %v245_v41, %v244_v40 }
 0x1e1   :  { %v247_v43 = vrot.slane %v246_v42, 1 }
 0x1e3   :  { %v248_v44 = vadd.f32 %v247_v43, %v246_v42 }
 0x1e5   :  { %250 = vst.msk [vmem:[%s441_s7] sm:$0xff] %vm211_vm2, %v248_v44 }

</bundles_post_ra>
